<compile_context>
chip_gen: v6e
topology: v6e:2x2x1
jax: 0.10.0
libtpu: 0.0.40
codegen_flags: <defaults>
</compile_context>

<pallas_src>
import jax
import jax.numpy as jnp
from jax import lax
from jax.experimental import pallas as pl
from jax.experimental.pallas import tpu as pltpu

LANE = 128
_TARGET_TILE_BYTES = 2 * 1024 * 1024  # per (double-buffered) input tile


def _make_hloss_kernel(C, TS, HW, nS, need_mask):
    """Build the kernel with static channel count / tile geometry baked in."""

    def kernel(x_ref, o_ref, acc_ref):
        # x_ref:   (1, C, TS, LANE)  one batch element, all channels, TS*LANE positions
        # o_ref:   (1, 8, LANE)      per-batch lane-dense partial sums (written at last step)
        # acc_ref: (TS, LANE) f32    running per-position entropy accumulator (VMEM scratch)
        s_idx = pl.program_id(1)

        @pl.when(s_idx == 0)
        def _():
            acc_ref[...] = jnp.zeros_like(acc_ref)

        # Numerically stable entropy via
        #   -sum_c p_c log p_c = log(S) - T/S,
        #   S = sum_c exp(z_c), T = sum_c z_c exp(z_c), z_c = x_c - max_c x_c.
        # Channel reduction is an unrolled elementwise loop over dense (TS, LANE)
        # tiles: pure VPU/EUP work, no cross-lane (XLU) reduce in steady state.
        m = x_ref[0, 0].astype(jnp.float32)
        for c in range(1, C):
            m = jnp.maximum(m, x_ref[0, c].astype(jnp.float32))

        z0 = x_ref[0, 0].astype(jnp.float32) - m
        e0 = jnp.exp(z0)
        s_sum = e0
        t_sum = e0 * z0
        for c in range(1, C):
            z = x_ref[0, c].astype(jnp.float32) - m
            e = jnp.exp(z)
            s_sum = s_sum + e
            t_sum = t_sum + e * z

        ent = jnp.log(s_sum) - t_sum / s_sum          # (TS, LANE), >= 0

        if need_mask:
            # Zero positions that exist only due to lane padding / partial tail tile.
            r = lax.broadcasted_iota(jnp.int32, (TS, LANE), 0)
            l = lax.broadcasted_iota(jnp.int32, (TS, LANE), 1)
            gidx = (s_idx * TS + r) * LANE + l
            ent = jnp.where(gidx < HW, ent, 0.0)

        acc_ref[...] = acc_ref[...] + ent

        @pl.when(s_idx == nS - 1)
        def _():
            # One cross-sublane reduce per batch element, stored lane-dense.
            row = jnp.sum(acc_ref[...], axis=0, keepdims=True)       # (1, LANE)
            rid = lax.broadcasted_iota(jnp.int32, (8, LANE), 0)
            o_ref[0] = jnp.where(rid == 0, row, 0.0)

    return kernel


def _hloss_impl(x):
    B, C, H, W = x.shape
    HW = H * W
    S = -(-HW // LANE)                 # spatial rows of 128 lanes
    pad = S * LANE - HW

    xr = x.reshape(B, C, HW)           # free merge of trailing contiguous dims (no transpose)
    if pad:
        # Only for ragged H*W (not a multiple of 128); masked in-kernel.
        xr = jnp.pad(xr, ((0, 0), (0, 0), (0, pad)))
    x4 = xr.reshape(B, C, S, LANE)

    itemsize = jnp.dtype(x.dtype).itemsize
    ts = max(8, (_TARGET_TILE_BYTES // (C * LANE * itemsize)) // 8 * 8)
    TS = S if S < 8 else min(S, ts)    # multiple of 8, or the full (small) dim
    nS = -(-S // TS)
    need_mask = (nS * TS * LANE) != HW
    # TODO(synk): for very large C (C*8*LANE*itemsize*2 approaching the VMEM budget),
    # the channel axis would also need tiling (online-softmax over channel chunks).

    kernel = _make_hloss_kernel(C, TS, HW, nS, need_mask)

    out = pl.pallas_call(
        kernel,
        out_shape=jax.ShapeDtypeStruct((B, 8, LANE), jnp.float32),
        grid_spec=pltpu.PrefetchScalarGridSpec(
            num_scalar_prefetch=0,
            grid=(B, nS),
            in_specs=[pl.BlockSpec((1, C, TS, LANE), lambda b, s: (b, 0, s, 0))],
            out_specs=pl.BlockSpec((1, 8, LANE), lambda b, s: (b, 0, 0)),
            scratch_shapes=[pltpu.VMEM((TS, LANE), jnp.float32)],
        ),
        compiler_params=pltpu.CompilerParams(
            dimension_semantics=("parallel", "arbitrary"),
            vmem_limit_bytes=32 * 1024 * 1024,
        ),
    )(x4)

    # Tiny final reduction of per-batch lane partials -> scalar entropy loss.
    return jnp.sum(out)


hloss = jax.jit(_hloss_impl)


if __name__ == "__main__":
    key = jax.random.PRNGKey(0)
    # Small segmentation-logit-like shape: (B, C, H, W)
    x = jax.random.normal(key, (2, 4, 16, 16), dtype=jnp.float32)

    result = hloss(x)
    jax.block_until_ready(result)

    # Cross-check against a plain-JAX reference of the PyTorch semantics.
    logp_ref = jax.nn.log_softmax(x, axis=1)
    p_ref = jax.nn.softmax(x, axis=1)
    ref = -1.0 * jnp.sum(p_ref * logp_ref)
    assert jnp.allclose(result, ref, rtol=1e-5, atol=1e-5), (result, ref)

    print("KERNEL_OK")
</pallas_src>

<mosaic_0001>
module attributes {stable_mosaic.version = 11 : i64} {
  func.func @kernel(%arg0: i32, %arg1: i32, %arg2: memref<1x4x2x128xf32, #tpu.memory_space<vmem>>, %arg3: memref<1x8x128xf32, #tpu.memory_space<vmem>>, %arg4: memref<2x128xf32, #tpu.memory_space<vmem>>) attributes {dimension_semantics = [#tpu.dimension_semantics<parallel>, #tpu.dimension_semantics<arbitrary>], iteration_bounds = array<i64: 2, 1>, scalar_prefetch = 0 : i64, scratch_operands = 1 : i64, tpu.core_type = #tpu.core_type<tc>, window_params = [{transform_indices = @transform_0, window_bounds = array<i64: 1, 4, 2, 128>}, {transform_indices = @transform_1, window_bounds = array<i64: 1, 8, 128>}]} {
    %c0_i32 = arith.constant 0 : i32
    %0 = arith.cmpi eq, %arg1, %c0_i32 : i32
    %1 = arith.extui %0 : i1 to i32
    %c0_i32_0 = arith.constant 0 : i32
    %2 = arith.cmpi ne, %1, %c0_i32_0 : i32
    scf.if %2 {
      %cst = arith.constant 0.000000e+00 : f32
      %49 = vector.broadcast %cst : f32 to vector<2x128xf32>
      %c0_35 = arith.constant 0 : index
      %c0_36 = arith.constant 0 : index
      %50 = vector.load %arg4[%c0_35, %c0_36] : memref<2x128xf32, #tpu.memory_space<vmem>>, vector<2x128xf32>
      tpu.vector_store %arg4[%c0_35, %c0_36], %49 {strides = array<i32>} : memref<2x128xf32, #tpu.memory_space<vmem>>, vector<2x128xf32>,
    } else {
    }
    %c0 = arith.constant 0 : index
    %c0_1 = arith.constant 0 : index
    %c0_2 = arith.constant 0 : index
    %c0_3 = arith.constant 0 : index
    %3 = vector.load %arg2[%c0, %c0_1, %c0_2, %c0_3] : memref<1x4x2x128xf32, #tpu.memory_space<vmem>>, vector<1x1x2x128xf32>
    %4 = vector.shape_cast %3 : vector<1x1x2x128xf32> to vector<2x128xf32>
    %c0_4 = arith.constant 0 : index
    %c1 = arith.constant 1 : index
    %c0_5 = arith.constant 0 : index
    %c0_6 = arith.constant 0 : index
    %5 = vector.load %arg2[%c0_4, %c1, %c0_5, %c0_6] : memref<1x4x2x128xf32, #tpu.memory_space<vmem>>, vector<1x1x2x128xf32>
    %6 = vector.shape_cast %5 : vector<1x1x2x128xf32> to vector<2x128xf32>
    %7 = arith.maximumf %4, %6 : vector<2x128xf32>
    %c0_7 = arith.constant 0 : index
    %c2 = arith.constant 2 : index
    %c0_8 = arith.constant 0 : index
    %c0_9 = arith.constant 0 : index
    %8 = vector.load %arg2[%c0_7, %c2, %c0_8, %c0_9] : memref<1x4x2x128xf32, #tpu.memory_space<vmem>>, vector<1x1x2x128xf32>
    %9 = vector.shape_cast %8 : vector<1x1x2x128xf32> to vector<2x128xf32>
    %10 = arith.maximumf %7, %9 : vector<2x128xf32>
    %c0_10 = arith.constant 0 : index
    %c3 = arith.constant 3 : index
    %c0_11 = arith.constant 0 : index
    %c0_12 = arith.constant 0 : index
    %11 = vector.load %arg2[%c0_10, %c3, %c0_11, %c0_12] : memref<1x4x2x128xf32, #tpu.memory_space<vmem>>, vector<1x1x2x128xf32>
    %12 = vector.shape_cast %11 : vector<1x1x2x128xf32> to vector<2x128xf32>
    %13 = arith.maximumf %10, %12 : vector<2x128xf32>
    %c0_13 = arith.constant 0 : index
    %c0_14 = arith.constant 0 : index
    %c0_15 = arith.constant 0 : index
    %c0_16 = arith.constant 0 : index
    %14 = vector.load %arg2[%c0_13, %c0_14, %c0_15, %c0_16] : memref<1x4x2x128xf32, #tpu.memory_space<vmem>>, vector<1x1x2x128xf32>
    %15 = vector.shape_cast %14 : vector<1x1x2x128xf32> to vector<2x128xf32>
    %16 = arith.subf %15, %13 : vector<2x128xf32>
    %17 = math.exp %16 : vector<2x128xf32>
    %18 = arith.mulf %17, %16 : vector<2x128xf32>
    %c0_17 = arith.constant 0 : index
    %c1_18 = arith.constant 1 : index
    %c0_19 = arith.constant 0 : index
    %c0_20 = arith.constant 0 : index
    %19 = vector.load %arg2[%c0_17, %c1_18, %c0_19, %c0_20] : memref<1x4x2x128xf32, #tpu.memory_space<vmem>>, vector<1x1x2x128xf32>
    %20 = vector.shape_cast %19 : vector<1x1x2x128xf32> to vector<2x128xf32>
    %21 = arith.subf %20, %13 : vector<2x128xf32>
    %22 = math.exp %21 : vector<2x128xf32>
    %23 = arith.addf %17, %22 : vector<2x128xf32>
    %24 = arith.mulf %22, %21 : vector<2x128xf32>
    %25 = arith.addf %18, %24 : vector<2x128xf32>
    %c0_21 = arith.constant 0 : index
    %c2_22 = arith.constant 2 : index
    %c0_23 = arith.constant 0 : index
    %c0_24 = arith.constant 0 : index
    %26 = vector.load %arg2[%c0_21, %c2_22, %c0_23, %c0_24] : memref<1x4x2x128xf32, #tpu.memory_space<vmem>>, vector<1x1x2x128xf32>
    %27 = vector.shape_cast %26 : vector<1x1x2x128xf32> to vector<2x128xf32>
    %28 = arith.subf %27, %13 : vector<2x128xf32>
    %29 = math.exp %28 : vector<2x128xf32>
    %30 = arith.addf %23, %29 : vector<2x128xf32>
    %31 = arith.mulf %29, %28 : vector<2x128xf32>
    %32 = arith.addf %25, %31 : vector<2x128xf32>
    %c0_25 = arith.constant 0 : index
    %c3_26 = arith.constant 3 : index
    %c0_27 = arith.constant 0 : index
    %c0_28 = arith.constant 0 : index
    %33 = vector.load %arg2[%c0_25, %c3_26, %c0_27, %c0_28] : memref<1x4x2x128xf32, #tpu.memory_space<vmem>>, vector<1x1x2x128xf32>
    %34 = vector.shape_cast %33 : vector<1x1x2x128xf32> to vector<2x128xf32>
    %35 = arith.subf %34, %13 : vector<2x128xf32>
    %36 = math.exp %35 : vector<2x128xf32>
    %37 = arith.addf %30, %36 : vector<2x128xf32>
    %38 = arith.mulf %36, %35 : vector<2x128xf32>
    %39 = arith.addf %32, %38 : vector<2x128xf32>
    %40 = math.log %37 : vector<2x128xf32>
    %41 = arith.divf %39, %37 : vector<2x128xf32>
    %42 = arith.subf %40, %41 : vector<2x128xf32>
    %c0_29 = arith.constant 0 : index
    %c0_30 = arith.constant 0 : index
    %43 = vector.load %arg4[%c0_29, %c0_30] : memref<2x128xf32, #tpu.memory_space<vmem>>, vector<2x128xf32>
    %44 = arith.addf %43, %42 : vector<2x128xf32>
    %c0_31 = arith.constant 0 : index
    %c0_32 = arith.constant 0 : index
    %45 = vector.load %arg4[%c0_31, %c0_32] : memref<2x128xf32, #tpu.memory_space<vmem>>, vector<2x128xf32>
    tpu.vector_store %arg4[%c0_31, %c0_32], %44 {strides = array<i32>} : memref<2x128xf32, #tpu.memory_space<vmem>>, vector<2x128xf32>,
    %c0_i32_33 = arith.constant 0 : i32
    %46 = arith.cmpi eq, %arg1, %c0_i32_33 : i32
    %47 = arith.extui %46 : i1 to i32
    %c0_i32_34 = arith.constant 0 : i32
    %48 = arith.cmpi ne, %47, %c0_i32_34 : i32
    scf.if %48 {
      %c0_35 = arith.constant 0 : index
      %c0_36 = arith.constant 0 : index
      %49 = vector.load %arg4[%c0_35, %c0_36] : memref<2x128xf32, #tpu.memory_space<vmem>>, vector<2x128xf32>
      %cst = arith.constant dense<0.000000e+00> : vector<128xf32>
      %50 = vector.multi_reduction <add>, %49, %cst [0] : vector<2x128xf32> to vector<128xf32>
      %51 = vector.shape_cast %50 : vector<128xf32> to vector<1x128xf32>
      %52 = tpu.iota {dimensions = array<i32: 0>} : vector<8x128xi32>
      %c0_i32_37 = arith.constant 0 : i32
      %53 = vector.broadcast %c0_i32_37 : i32 to vector<8x128xi32>
      %54 = arith.cmpi eq, %52, %53 : vector<8x128xi32>
      %cst_38 = arith.constant 0.000000e+00 : f32
      %55 = vector.shape_cast %51 : vector<1x128xf32> to vector<1x128xf32>
      %56 = vector.broadcast %55 : vector<1x128xf32> to vector<8x128xf32>
      %57 = vector.broadcast %cst_38 : f32 to vector<8x128xf32>
      %58 = arith.select %54, %56, %57 : vector<8x128xi1>, vector<8x128xf32>
      %c0_39 = arith.constant 0 : index
      %c0_40 = arith.constant 0 : index
      %c0_41 = arith.constant 0 : index
      %59 = vector.load %arg3[%c0_39, %c0_40, %c0_41] : memref<1x8x128xf32, #tpu.memory_space<vmem>>, vector<1x8x128xf32>
      %60 = vector.shape_cast %59 : vector<1x8x128xf32> to vector<8x128xf32>
      %61 = vector.shape_cast %58 : vector<8x128xf32> to vector<1x8x128xf32>
      tpu.vector_store %arg3[%c0_39, %c0_40, %c0_41], %61 {strides = array<i32>} : memref<1x8x128xf32, #tpu.memory_space<vmem>>, vector<1x8x128xf32>,
    } else {
    }
    return
  }
  func.func @transform_0(%arg0: i32, %arg1: i32) -> (i32, i32, i32, i32) {
    %c0_i32 = arith.constant 0 : i32
    %c0_i32_0 = arith.constant 0 : i32
    %c0_i32_1 = arith.constant 0 : i32
    return %arg0, %c0_i32, %arg1, %c0_i32_0 : i32, i32, i32, i32
  }
  func.func @transform_1(%arg0: i32, %arg1: i32) -> (i32, i32, i32) {
    %c0_i32 = arith.constant 0 : i32
    %c0_i32_0 = arith.constant 0 : i32
    %c0_i32_1 = arith.constant 0 : i32
    return %arg0, %c0_i32, %c0_i32_0 : i32, i32, i32
  }
}

</mosaic_0001>

<bundles_post_ra>
// kernel: _hloss_impl.1
= control target key start
LH: loop header
LB: loop body
LE: loop exit
PB: predicated region body
PF: predicated region fallthrough
CT: control target
= control target key end

     0   :  { %s353_s6 = smov 0   ;;  %s355_s7 = smov 0   ;;  %s393_s0 = inlined_call_operand.vmem [shape: f32[2,4,2,128], index: 0, kind: input, shape index: {}]   ;;  %s394_s1 = inlined_call_operand.vmem [shape: f32[2,8,128], index: 1, kind: output, shape index: {}]  }
   0x1   :  { %s357_s8 = smov 0  }
   0x2 LB: > { %s23_s9 = sadd.s32 1, %s336_s7  ;;  %p271_p0 = scmp.ge.s32.totalorder %s340_s8, 1  ;;  %s340_s8 = sphi %s357_s8, %s11_s8   ;;  %s336_s7 = sphi %s355_s7, %s396_s7   ;;  %s332_s6 = sphi %s353_s6, %s395_s6  }
   0x3   : > { %p25_p1 = scmp.ge.s32.totalorder %s23_s9, 2  ;;  %p104_p2 = scmp.lt.s32.totalorder %s340_s8, 3 }
   0x5   : > { %s398_s9 = smov (%p25_p1, %s23_s9), 0  ;;  %p105_p3 = pnand %p271_p0, %p104_p2 }
   0x6   : > { %p126_p4 = scmp.lt.s32.totalorder (!%p105_p3), %s332_s6, 1 }
   0x7   : > { %108 = sbr.rel (%p105_p3) target bundleno = 91 (0x5b), region = 24 }
   0xc   : > { %v342_v0 = vmov 0.0   ;;  %s400_s6 = smov (!%p126_p4, %s332_s6), 1  ;;  %vm187_vm0 = vcmask 1041408   ;;  %v195_v40 = vlaneseq }
   0xd   : > { %142 = vst [vmem:[#allocation2] sm:$0x3] %v342_v0  ;;  %s280_s10 = sshll.u32 %s400_s6, 3 }
   0xe   : > { %s133_s13 = scalar_lea.vmem %s393_s0, %s280_s10  ;;  %v196_v43 = vshrl.u32 %v195_v40, 7  ;;  %s137_s16 = scalar_lea.vmem %s394_s1, %s280_s10 }
   0xf   : > { %v143_v1 = vld [vmem:[%s133_s13] sm:$0x3]  ;;  %v275_v2 = vld [vmem:[%s133_s13 + $0x2] sm:$0x3]  ;;  %v276_v3 = vld [vmem:[%s133_s13 + $0x4] sm:$0x3] }
  0x10   : > { %v146_v4 = vmax.f32 %v143_v1, %v275_v2  ;;  %v277_v5 = vld [vmem:[%s133_s13 + $0x6] sm:$0x3]  ;;  %vm197_vm1 = vcmp.eq.s32.totalorder %v196_v43, 0 }
  0x12   : > { %v149_v6 = vmax.f32 %v146_v4, %v276_v3 }
  0x14   : > { %v152_v7 = vmax.f32 %v149_v6, %v277_v5  ;;  %v180_v34 = vld [vmem:[#allocation2] sm:$0x3] }
  0x16   : > { %v153_v8 = vsub.f32 %v143_v1, %v152_v7  ;;  %v157_v9 = vsub.f32 %v275_v2, %v152_v7  ;;  %v163_v10 = vsub.f32 %v276_v3, %v152_v7  ;;  %v169_v11 = vsub.f32 %v277_v5, %v152_v7 }
  0x18   : > { %v154_v12 = vmul.f32 1.442695, %v153_v8  ;;  %v158_v13 = vmul.f32 1.442695, %v157_v9  ;;  %v164_v14 = vmul.f32 1.442695, %v163_v10 }
  0x19   : > { %v170_v15 = vmul.f32 1.442695, %v169_v11 }
  0x1a   : > { %306 = vpow2.f32 %v154_v12 }
  0x1b   : > { %308 = vpow2.f32 %v158_v13 }
  0x1c   : > { %310 = vpow2.f32 %v164_v14 }
  0x1d   : > { %312 = vpow2.f32 %v170_v15 }
  0x27   : > { %v307_v16 = vpop.eup %306 }
  0x28   : > { %v309_v17 = vpop.eup %308  ;;  %v156_v23 = vmul.f32 %v307_v16, %v153_v8 }
  0x29   : > { %v311_v18 = vpop.eup %310  ;;  %v160_v19 = vadd.f32 %v309_v17, %v307_v16  ;;  %v161_v24 = vmul.f32 %v309_v17, %v157_v9 }
  0x2a   : > { %v313_v20 = vpop.eup %312  ;;  %v167_v26 = vmul.f32 %v311_v18, %v163_v10 }
  0x2b   : > { %v166_v21 = vadd.f32 %v311_v18, %v160_v19  ;;  %v162_v25 = vadd.f32 %v161_v24, %v156_v23  ;;  %v173_v28 = vmul.f32 %v313_v20, %v169_v11 }
  0x2d   : > { %v172_v22 = vadd.f32 %v313_v20, %v166_v21  ;;  %v168_v27 = vadd.f32 %v167_v26, %v162_v25 }
  0x2f   : > { %314 = vlog2.f32 %v172_v22  ;;  %v174_v29 = vadd.f32 %v173_v28, %v168_v27 }
  0x30   : > { %316 = vrcp.f32 %v172_v22 }
  0x3c   : > { %v315_v30 = vpop.eup %314 }
  0x3d   : > { %v317_v31 = vpop.eup %316  ;;  %v176_v32 = vmul.f32 0.6931472, %v315_v30 }
  0x3e   : > { %v178_v33 = vmul.f32 %v317_v31, %v174_v29 }
  0x40   : > { %v179_v35 = vsub.f32 %v176_v32, %v178_v33 }
  0x42   : > { %v181_v36 = vadd.f32 %v180_v34, %v179_v35 }
  0x44   : > { %182 = vst [vmem:[#allocation2] sm:$0x3] %v181_v36 }
  0x4b   : > { %v186_v37 = vld [vmem:[#allocation2] sm:$0x3] }
  0x4c   : > { %v188_v38 = vsel %vm187_vm0, %v186_v37, 0.0 }
  0x4d   : > { %v189_v39 = vrot.slane %v188_v38, 4 }
  0x4f   : > { %v190_v41 = vadd.f32 %v189_v39, %v188_v38 }
  0x51   : > { %v191_v42 = vrot.slane %v190_v41, 2 }
  0x53   : > { %v192_v44 = vadd.f32 %v191_v42, %v190_v41 }
  0x55   : > { %v193_v45 = vrot.slane %v192_v44, 1 }
  0x57   : > { %v194_v46 = vadd.f32 %v193_v45, %v192_v44 }
  0x59   : > { %v198_v47 = vsel %vm197_vm1, %v194_v46, 0.0 }
  0x5a   : > { %199 = vst [vmem:[%s137_s16] sm:$0xff] %v198_v47 }
  0x5b PF: > { %s11_s8 = sadd.s32 1, %s340_s8   ;;  %s395_s6 = smov %s336_s7 }
  0x5c   : > { %p8_p5 = scmp.ge.s32.totalorder %s11_s8, 4   ;;  %s396_s7 = smov %s398_s9 }
  0x5e   :  { %10 = sbr.rel (!%p8_p5) target bundleno = 2 (0x2), region = 65 }

</bundles_post_ra>
